<compile_context>
chip_gen: v7x
topology: tpu7x:2x2x1
jax: 0.10.0
libtpu: 0.0.40
codegen_flags: <defaults>
</compile_context>

<pallas_src>
import functools

import jax
import jax.numpy as jnp
from jax.experimental import pallas as pl
from jax.experimental.pallas import tpu as pltpu


def _smooth_l1_partial_kernel(pred_ref, label_ref, out_ref, *,
                              smooth: float, beta: float, tail_rows: int):
    """Writes the (1, C) lane-vector partial sum of element-wise smooth-L1
    between softmax(pred_tile) and the label-smoothed one-hot target."""
    pred = pred_ref[...].astype(jnp.float32)            # (TILE_N, C)
    labels = label_ref[...]                              # (TILE_N, 1) int32
    tn, c = pred.shape

    # Numerically-stable softmax along the class (lane) axis.
    # Per-row reciprocal (EUP) + multiply instead of per-element divide.
    m = jnp.max(pred, axis=1, keepdims=True)
    e = jnp.exp(pred - m)
    s = jnp.sum(e, axis=1, keepdims=True)
    p = e * pl.reciprocal(s, approx=False)               # (TILE_N, C)

    # Label-smoothed one-hot target built in-register (no scatter).
    class_ids = jax.lax.broadcasted_iota(jnp.int32, (tn, c), 1)
    target = jnp.where(class_ids == labels,
                       jnp.float32(1.0 - smooth),
                       jnp.float32(smooth / (c - 1)))

    # Element-wise smooth-L1 (Huber, beta = 1.0 like F.smooth_l1_loss default).
    half_over_beta = jnp.float32(0.5 / beta)             # folded in Python
    half_beta = jnp.float32(0.5 * beta)
    d = jnp.abs(p - target)
    elem = jnp.where(d < beta, d * d * half_over_beta, d - half_beta)

    if tail_rows == 0:
        # All tiles are full: no padded-row masking needed anywhere.
        out_ref[...] = jnp.sum(elem, axis=0, keepdims=True)
    else:
        i = pl.program_id(0)
        last = pl.num_programs(0) - 1

        @pl.when(i != last)
        def _full_tile():
            out_ref[...] = jnp.sum(elem, axis=0, keepdims=True)

        @pl.when(i == last)
        def _tail_tile():
            # Mask Pallas-padded rows (select, so garbage/NaN cannot leak).
            row_ids = jax.lax.broadcasted_iota(jnp.int32, (tn, c), 0)
            masked = jnp.where(row_ids < tail_rows, elem, jnp.float32(0.0))
            out_ref[...] = jnp.sum(masked, axis=0, keepdims=True)


def _choose_tile_n(n: int, c: int, itemsize: int,
                   target_bytes: int = 8 * 1024 * 1024,
                   vmem_budget_bytes: int = 40 * 1024 * 1024) -> int:
    """Pick a batch tile: ~target_bytes per block, sublane-aligned, with the
    double-buffered (pred + labels) footprint kept inside vmem_budget_bytes."""
    row_align = 16 if itemsize < 4 else 8                # bf16 packs 16 sublanes
    row_bytes = max(1, c * itemsize)
    rows = (target_bytes // row_bytes) // row_align * row_align
    max_rows = (vmem_budget_bytes // (2 * (row_bytes + 4))) // row_align * row_align
    rows = min(rows, max_rows)
    rows = max(row_align, rows)
    return n if rows >= n else rows


def smooth_l1_loss(pred: jax.Array, real: jax.Array, smooth: float = 0.1,
                   beta: float = 1.0, tile_n: int | None = None) -> jax.Array:
    """pred: (N, C) float logits; real: (N,) int class labels. Scalar loss."""
    n, c = pred.shape
    labels = real.astype(jnp.int32).reshape(n, 1)

    if tile_n is None:
        tile_n = _choose_tile_n(n, c, pred.dtype.itemsize)
    tile_n = int(min(tile_n, n))
    num_tiles = pl.cdiv(n, tile_n)
    tail_rows = n % tile_n                                # 0 -> every tile full

    kernel = functools.partial(_smooth_l1_partial_kernel, smooth=float(smooth),
                               beta=float(beta), tail_rows=int(tail_rows))

    # Size the scoped-VMEM limit from the actual double-buffered block footprint.
    block_bytes = tile_n * (c * pred.dtype.itemsize + labels.dtype.itemsize)
    vmem_limit = int(min(48 * 1024 * 1024,
                         max(32 * 1024 * 1024, 2 * block_bytes + 8 * 1024 * 1024)))

    partials = pl.pallas_call(
        kernel,
        out_shape=jax.ShapeDtypeStruct((num_tiles, c), jnp.float32),
        grid=(num_tiles,),
        in_specs=[
            pl.BlockSpec((tile_n, c), lambda i: (i, 0)),   # pred batch tile
            pl.BlockSpec((tile_n, 1), lambda i: (i, 0)),   # labels column tile
        ],
        out_specs=pl.BlockSpec((1, c), lambda i: (i, 0)),  # per-tile partial row
        compiler_params=pltpu.CompilerParams(
            dimension_semantics=("parallel",),             # independent tiles
            vmem_limit_bytes=vmem_limit,
        ),
    )(pred, labels)

    # Tiny final reduction (num_tiles * C floats) done outside the kernel.
    return jnp.sum(partials) / jnp.float32(n * c)


def _reference(pred, real, smooth=0.1, beta=1.0):
    """Pure-JAX reference mirroring the PyTorch module."""
    n, c = pred.shape
    target = jnp.full((n, c), smooth / (c - 1), jnp.float32)
    target = target.at[jnp.arange(n), real].set(1.0 - smooth)
    p = jax.nn.softmax(pred.astype(jnp.float32), axis=1)
    d = jnp.abs(p - target)
    elem = jnp.where(d < beta, 0.5 * d * d / beta, d - 0.5 * beta)
    return jnp.mean(elem)


if __name__ == "__main__":
    key = jax.random.PRNGKey(0)
    kp, kl = jax.random.split(key)

    # Small classification batch consistent with the module: (N, C) logits.
    N, C = 8, 16
    pred = jax.random.normal(kp, (N, C), dtype=jnp.float32)
    real = jax.random.randint(kl, (N,), 0, C, dtype=jnp.int32)

    loss = jax.block_until_ready(smooth_l1_loss(pred, real, smooth=0.1))
    ref = _reference(pred, real, smooth=0.1)
    assert jnp.allclose(loss, ref, atol=1e-5, rtol=1e-5), (loss, ref)

    # Exercises the multi-tile "parallel" grid, per-tile partial outputs and
    # the gated partial-last-tile masking path (N not divisible by TILE_N).
    kp2, kl2 = jax.random.split(jax.random.PRNGKey(0))
    N2, C2 = 20, 16
    pred2 = jax.random.normal(kp2, (N2, C2), dtype=jnp.float32)
    real2 = jax.random.randint(kl2, (N2,), 0, C2, dtype=jnp.int32)
    loss2 = jax.block_until_ready(
        smooth_l1_loss(pred2, real2, smooth=0.1, tile_n=8))
    ref2 = _reference(pred2, real2, smooth=0.1)
    assert jnp.allclose(loss2, ref2, atol=1e-5, rtol=1e-5), (loss2, ref2)

    # bf16-logits path (halves HBM traffic on v5e/v6e); compute stays f32.
    pred3 = pred2.astype(jnp.bfloat16)
    loss3 = jax.block_until_ready(
        smooth_l1_loss(pred3, real2, smooth=0.1, tile_n=16))
    ref3 = _reference(pred3, real2, smooth=0.1)
    assert jnp.allclose(loss3, ref3, atol=1e-4, rtol=1e-4), (loss3, ref3)

    print("KERNEL_OK")
</pallas_src>

<mosaic_0001>
module attributes {stable_mosaic.version = 11 : i64} {
  func.func @_smooth_l1_partial_kernel(%arg0: i32, %arg1: memref<8x16xf32, #tpu.memory_space<vmem>>, %arg2: memref<8x1xi32, #tpu.memory_space<vmem>>, %arg3: memref<1x16xf32, #tpu.memory_space<vmem>>) attributes {dimension_semantics = [#tpu.dimension_semantics<parallel>], iteration_bounds = array<i64: 1>, scalar_prefetch = 0 : i64, scratch_operands = 0 : i64, tpu.core_type = #tpu.core_type<tc>, window_params = [{transform_indices = @transform_0, window_bounds = array<i64: 8, 16>}, {transform_indices = @transform_1, window_bounds = array<i64: 8, 1>}, {transform_indices = @transform_2, window_bounds = array<i64: 1, 16>}]} {
    %c0 = arith.constant 0 : index
    %c0_0 = arith.constant 0 : index
    %0 = vector.load %arg1[%c0, %c0_0] : memref<8x16xf32, #tpu.memory_space<vmem>>, vector<8x16xf32>
    %c0_1 = arith.constant 0 : index
    %c0_2 = arith.constant 0 : index
    %1 = vector.load %arg2[%c0_1, %c0_2] : memref<8x1xi32, #tpu.memory_space<vmem>>, vector<8x1xi32>
    %cst = arith.constant dense<0xFF800000> : vector<8xf32>
    %2 = vector.multi_reduction <maximumf>, %0, %cst [1] : vector<8x16xf32> to vector<8xf32>
    %3 = vector.shape_cast %2 : vector<8xf32> to vector<8x1xf32>
    %4 = vector.broadcast %3 : vector<8x1xf32> to vector<8x16xf32>
    %5 = arith.subf %0, %4 : vector<8x16xf32>
    %6 = math.exp %5 : vector<8x16xf32>
    %cst_3 = arith.constant dense<0.000000e+00> : vector<8xf32>
    %7 = vector.multi_reduction <add>, %6, %cst_3 [1] : vector<8x16xf32> to vector<8xf32>
    %8 = vector.shape_cast %7 : vector<8xf32> to vector<8x1xf32>
    %9 = tpu.reciprocal %8 : vector<8x1xf32> -> vector<8x1xf32>
    %10 = vector.broadcast %9 : vector<8x1xf32> to vector<8x16xf32>
    %11 = arith.mulf %6, %10 : vector<8x16xf32>
    %12 = tpu.iota {dimensions = array<i32: 1>} : vector<8x16xi32>
    %13 = vector.broadcast %1 : vector<8x1xi32> to vector<8x16xi32>
    %14 = arith.cmpi eq, %12, %13 : vector<8x16xi32>
    %cst_4 = arith.constant 0.899999976 : f32
    %cst_5 = arith.constant 0.00666666683 : f32
    %15 = vector.broadcast %cst_4 : f32 to vector<8x16xf32>
    %16 = vector.broadcast %cst_5 : f32 to vector<8x16xf32>
    %17 = arith.select %14, %15, %16 : vector<8x16xi1>, vector<8x16xf32>
    %18 = arith.subf %11, %17 : vector<8x16xf32>
    %19 = math.absf %18 : vector<8x16xf32>
    %cst_6 = arith.constant 1.000000e+00 : f32
    %20 = vector.broadcast %cst_6 : f32 to vector<8x16xf32>
    %21 = arith.cmpf olt, %19, %20 : vector<8x16xf32>
    %22 = arith.mulf %19, %19 : vector<8x16xf32>
    %cst_7 = arith.constant 5.000000e-01 : f32
    %23 = vector.broadcast %cst_7 : f32 to vector<8x16xf32>
    %24 = arith.mulf %22, %23 : vector<8x16xf32>
    %cst_8 = arith.constant 5.000000e-01 : f32
    %25 = vector.broadcast %cst_8 : f32 to vector<8x16xf32>
    %26 = arith.subf %19, %25 : vector<8x16xf32>
    %27 = arith.select %21, %24, %26 : vector<8x16xi1>, vector<8x16xf32>
    %cst_9 = arith.constant dense<0.000000e+00> : vector<16xf32>
    %28 = vector.multi_reduction <add>, %27, %cst_9 [0] : vector<8x16xf32> to vector<16xf32>
    %29 = vector.shape_cast %28 : vector<16xf32> to vector<1x16xf32>
    %c0_10 = arith.constant 0 : index
    %c0_11 = arith.constant 0 : index
    %30 = vector.load %arg3[%c0_10, %c0_11] : memref<1x16xf32, #tpu.memory_space<vmem>>, vector<1x16xf32>
    tpu.vector_store %arg3[%c0_10, %c0_11], %29 {strides = array<i32>} : memref<1x16xf32, #tpu.memory_space<vmem>>, vector<1x16xf32>,
    return
  }
  func.func @transform_0(%arg0: i32) -> (i32, i32) {
    %c0_i32 = arith.constant 0 : i32
    %c0_i32_0 = arith.constant 0 : i32
    return %arg0, %c0_i32 : i32, i32
  }
  func.func @transform_1(%arg0: i32) -> (i32, i32) {
    %c0_i32 = arith.constant 0 : i32
    %c0_i32_0 = arith.constant 0 : i32
    return %arg0, %c0_i32 : i32, i32
  }
  func.func @transform_2(%arg0: i32) -> (i32, i32) {
    %c0_i32 = arith.constant 0 : i32
    %c0_i32_0 = arith.constant 0 : i32
    return %arg0, %c0_i32 : i32, i32
  }
}

</mosaic_0001>

<bundles_post_ra>
// kernel: tpu_custom_call.1
= control target key start
LH: loop header
LB: loop body
LE: loop exit
PB: predicated region body
PF: predicated region fallthrough
CT: control target
= control target key end

     0   :  { %vm14_vm0 = vcmask 130048   ;;  %s136_s0 = inlined_call_operand.vmem [shape: f32[8,16], index: 0, kind: input, shape index: {}]   ;;  %s137_s1 = inlined_call_operand.vmem [shape: s32[8,1], index: 1, kind: input, shape index: {}]   ;;  %s138_s2 = inlined_call_operand.hbm [shape: f32[1,16], index: 2, kind: output, shape index: {}]  }
   0x1   :  { %v12_v0 = vld [vmem:[%s136_s0] sm:$0xff] }
   0x2   :  { %7 = vsyncpa [#allocation3], 0  ;;  %v15_v1 = vsel %vm14_vm0, %v12_v0, -inf  ;;  %v13_v2 = vld [vmem:[%s137_s1] sm:$0xff]  ;;  %v97_v3 = vmov 0   ;;  %v26_v10 = vlaneseq  ;;  %s99_s0 = smov [#allocation2]  }
   0x3   :  { %16 = vmax.xlane.f32.xlu0 %v15_v1  ;;  %67 = vset.pattern.permute.xlu1 %v97_v3  ;;  %v98_v14 = vmov 0.006666667   ;;  %s55_s1 = sshll.u32 %s99_s0, 4  ;;  %vm47_vm3 = vcmask 122880   ;;  %s56_s1 = int_to_ptr.vmem [resolvable:$true] %s55_s1 }
   0x4   :  { %68 = vset.pattern.permute.xlu0 %v97_v3  ;;  %29 = vperm.xlu1 %67, %v13_v2   ;;  %v27_v11 = vand.u32 127, %v26_v10  ;;  %s73_s13 = scalar_lea.vmem %s56_s1, 16  ;;  %s77_s14 = scalar_lea.vmem %s56_s1, 32 }
   0x5   :  { %p74_p0 = scmp.ne.s32.totalorder %s56_s1, %s73_s13  ;;  %p78_p1 = scmp.lt.s32.totalorder %s56_s1, %s56_s1 }
   0x6   :  { %p79_p2 = scmp.lt.s32.totalorder %s77_s14, %s73_s13 }
   0x8   :  { %p80_p3 = por %p79_p2, %p78_p1 }
   0xa   :  { %p81_p4 = pnand %p80_p3, %p74_p0 }
  0x83   :  { %v30_v12 = vpop.permute.xlu1 %29 }
  0x84   :  { %vm31_vm1 = vcmp.eq.s32.totalorder %v27_v11, %v30_v12 }
  0x85   :  { %v32_v15 = vsel %vm31_vm1, 0.9, %v98_v14 }
  0x90   :  { %v17_v4 = vpop.xlane.xlu0 %16 }
  0x91   :  { %v18_v5 = vsub.f32 %v12_v0, %v17_v4 }
  0x93   :  { %v19_v6 = vmul.f32 1.442695, %v18_v5 }
  0x95   :  { %69 = vpow2.f32 %v19_v6 }
  0x9f   :  { %v70_v7 = vpop.eup %69 }
  0xa0   :  { %v21_v8 = vsel %vm14_vm0, %v70_v7, 0.0 }
  0xa1   :  { %22 = vadd.xlane.f32.xlu0 %v21_v8 }
 0x12e   :  { %v23_v9 = vpop.xlane.xlu0 %22 }
 0x12f   :  { %71 = vrcp.f32 %v23_v9 }
 0x139   :  { %v72_v13 = vpop.eup %71 }
 0x13a   :  { %v25_v16 = vmul.f32 %v72_v13, %v70_v7 }
 0x13c   :  { %v33_v17 = vsub.f32 %v25_v16, %v32_v15 }
 0x13e   :  { %v34_v18 = vand.u32 2147483647, %v33_v17 }
 0x140   :  { %v36_v19 = vmul.f32 %v34_v18, %v34_v18  ;;  %v63_v21 = vadd.f32 -0.5, %v34_v18  ;;  %vm35_vm2 = vcmp.lt.f32.partialorder %v34_v18, 1.0 }
 0x142   :  { %v37_v20 = vmul.f32 0.5, %v36_v19 }
 0x144   :  { %v39_v22 = vsel %vm35_vm2, %v37_v20, %v63_v21 }
 0x145   :  { %v40_v23 = vsel %vm14_vm0, %v39_v22, 0.0 }
 0x146   :  { %v41_v24 = vrot.slane %v40_v23, 4 }
 0x148   :  { %v42_v25 = vadd.f32 %v41_v24, %v40_v23 }
 0x14a   :  { %v43_v26 = vrot.slane %v42_v25, 2 }
 0x14c   :  { %v44_v27 = vadd.f32 %v43_v26, %v42_v25 }
 0x14e   :  { %v45_v28 = vrot.slane %v44_v27, 1 }
 0x150   :  { %v46_v29 = vadd.f32 %v45_v28, %v44_v27 }
 0x152   :  { %48 = vst.msk [vmem:[#allocation2] sm:$0x1] %vm47_vm3, %v46_v29 }
 0x153   :  { %84 = shalt.err (!%p81_p4)
}
 0x154   :  { %s85_s17 = scalar_lea.hbm %s138_s2, 16 }
 0x155   :  { %p86_p5 = scmp.ne.s32.totalorder %s138_s2, %s85_s17  ;;  %p89_p6 = scmp.lt.u32.totalorder %s85_s17, %s138_s2 }
 0x157   :  { %p91_p7 = pnand %p89_p6, %p86_p5 }
 0x159   :  { %94 = shalt.err (!%p91_p7)
}
 0x15a   :  { %58 = dma.vmem_to_hbm [thread:$0]  %s56_s1, 16, %s138_s2, [#allocation3]  }
 0x15b   :  { %95 = dma.done.wait [#allocation3], 16  }
 0x15c   :  { %96 = vsyncadd [#allocation3], 4294967280 }
 0x15d   :  { %62 = vsyncpa [#allocation3], 1 }

</bundles_post_ra>
